<compile_context>
chip_gen: v7x
topology: tpu7x:2x2x1
jax: 0.10.0
libtpu: 0.0.40
codegen_flags: <defaults>
</compile_context>

<pallas_src>
import jax
import jax.numpy as jnp
from jax.experimental import pallas as pl
from jax.experimental.pallas import tpu as pltpu


def combiner_kernel(x_ref, wih_ref, whh_ref, bx_ref, bhn_ref,
                    w1_ref, b1_ref, w2_ref, b2_ref, w3_ref, b3_ref,
                    out_ref):
    TB, _ = x_ref.shape
    B = out_ref.shape[0]
    T = TB // B
    H = whh_ref.shape[0]

    # Fused weights (gate order r | z | n on the lane axis), loaded once.
    wih = wih_ref[...]                       # (E, 3H)
    whh = whh_ref[...]                       # (H, 3H)

    # Input projections for ALL timesteps hoisted out of the recurrence:
    # one (T*B, E) @ (E, 3H) MXU pass.  bx already folds b_ih + [b_hr, b_hz, 0].
    x_proj = (jnp.dot(x_ref[...], wih, preferred_element_type=jnp.float32)
              + bx_ref[...])                 # (T*B, 3H)

    # Remaining hidden bias (b_hn), broadcast once outside the loop.
    bhn = jnp.broadcast_to(bhn_ref[...], (B, H))

    # Serial recurrence: one MXU op per step + VPU/EUP gate math. Fully
    # unrolled (static small T).
    h = jnp.zeros((B, H), dtype=jnp.float32)
    for t in range(T):
        xp = x_proj[t * B:(t + 1) * B, :]                           # (B, 3H)
        gh = jnp.dot(h, whh, preferred_element_type=jnp.float32)    # (B, 3H)
        r = jax.nn.sigmoid(xp[:, :H] + gh[:, :H])
        z = jax.nn.sigmoid(xp[:, H:2 * H] + gh[:, H:2 * H])
        n = jnp.tanh(xp[:, 2 * H:] + r * (gh[:, 2 * H:] + bhn))
        h = n + z * (h - n)                                         # (1-z)n + zh

    # MLP head.
    h1 = jnp.maximum(
        jnp.dot(h, w1_ref[...], preferred_element_type=jnp.float32)
        + b1_ref[...], 0.0)
    h2 = jnp.maximum(
        jnp.dot(h1, w2_ref[...], preferred_element_type=jnp.float32)
        + b2_ref[...], 0.0)
    out_ref[...] = jax.nn.sigmoid(
        jnp.dot(h2, w3_ref[...], preferred_element_type=jnp.float32)
        + b3_ref[...])


def combiner_forward(tokens, params):
    """tokens: (B, T) int32 -> (B, 1) float32."""
    B, T = tokens.shape
    H = params["whh"].shape[0]
    emb = params["embedding"]

    # Gather directly in time-major flattened order: row t*B + b == (t, b).
    idx = jnp.reshape(jnp.transpose(tokens), (-1,))                 # (T*B,)
    x_flat = jnp.take(emb, idx, axis=0)                             # (T*B, E)

    # Param-only bias folding (done once in the XLA glue path):
    #   bx  = b_ih + [b_hr, b_hz, 0]   (goes into the hoisted x projection)
    #   bhn = b_hn                     (stays inside r * (h @ W_hn + b_hn))
    bhh = params["bhh"]
    bx = params["bih"] + jnp.concatenate(
        [bhh[:, :2 * H], jnp.zeros((1, H), bhh.dtype)], axis=1)     # (1, 3H)
    bhn = bhh[:, 2 * H:]                                            # (1, H)

    vmem = pl.BlockSpec(memory_space=pltpu.MemorySpace.VMEM)
    args = (x_flat,
            params["wih"], params["whh"], bx, bhn,
            params["w1"], params["b1"],
            params["w2"], params["b2"],
            params["w3"], params["b3"])

    return pl.pallas_call(
        combiner_kernel,
        out_shape=jax.ShapeDtypeStruct((B, 1), jnp.float32),
        in_specs=[vmem] * len(args),
        out_specs=vmem,
    )(*args)


def init_params(key, vocab_size, embedding_dim, hidden_dim, synthon_hidden_dim):
    ks = jax.random.split(key, 12)
    s = 0.1
    E, H, S = embedding_dim, hidden_dim, synthon_hidden_dim
    return {
        "embedding": s * jax.random.normal(ks[0], (vocab_size, E), jnp.float32),
        # Fused GRU weights, gate order (r | z | n) concatenated on the last
        # axis; stored so the kernel computes x @ W (i.e. PyTorch W^T).
        "wih": s * jax.random.normal(ks[1], (E, 3 * H), jnp.float32),
        "whh": s * jax.random.normal(ks[2], (H, 3 * H), jnp.float32),
        "bih": s * jax.random.normal(ks[3], (1, 3 * H), jnp.float32),
        "bhh": s * jax.random.normal(ks[4], (1, 3 * H), jnp.float32),
        "w1": s * jax.random.normal(ks[5], (H, S), jnp.float32),
        "b1": s * jax.random.normal(ks[6], (1, S), jnp.float32),
        "w2": s * jax.random.normal(ks[7], (S, S), jnp.float32),
        "b2": s * jax.random.normal(ks[8], (1, S), jnp.float32),
        "w3": s * jax.random.normal(ks[9], (S, 1), jnp.float32),
        "b3": s * jax.random.normal(ks[10], (1, 1), jnp.float32),
    }


def combiner_reference(tokens, params):
    """Pure-JAX reference mirroring torch.nn.GRU semantics (for verification)."""
    x = jnp.take(params["embedding"], tokens, axis=0)               # (B, T, E)
    B = tokens.shape[0]
    H = params["whh"].shape[0]
    wih, whh = params["wih"], params["whh"]
    bih, bhh = params["bih"], params["bhh"]

    def step(h, x_t):
        gi = x_t @ wih + bih                                        # (B, 3H)
        gh = h @ whh + bhh                                          # (B, 3H)
        r = jax.nn.sigmoid(gi[:, :H] + gh[:, :H])
        z = jax.nn.sigmoid(gi[:, H:2 * H] + gh[:, H:2 * H])
        n = jnp.tanh(gi[:, 2 * H:] + r * gh[:, 2 * H:])
        return (1.0 - z) * n + z * h, None

    h, _ = jax.lax.scan(step, jnp.zeros((B, H), jnp.float32),
                        jnp.transpose(x, (1, 0, 2)))
    h1 = jax.nn.relu(h @ params["w1"] + params["b1"])
    h2 = jax.nn.relu(h1 @ params["w2"] + params["b2"])
    return jax.nn.sigmoid(h2 @ params["w3"] + params["b3"])


if __name__ == "__main__":
    vocab_size, embedding_dim, hidden_dim, synthon_hidden_dim = 50, 32, 32, 32
    B, T = 2, 8

    key = jax.random.PRNGKey(0)
    k_tok, k_par = jax.random.split(key)
    tokens = jax.random.randint(k_tok, (B, T), 0, vocab_size, dtype=jnp.int32)
    params = init_params(k_par, vocab_size, embedding_dim, hidden_dim,
                         synthon_hidden_dim)

    out = combiner_forward(tokens, params)
    out = jax.block_until_ready(out)

    ref = combiner_reference(tokens, params)
    assert out.shape == (B, 1)
    assert jnp.allclose(out, ref, atol=2e-5, rtol=1e-5), (out, ref)
    print("KERNEL_OK")
</pallas_src>

<mosaic_0001>
module attributes {stable_mosaic.version = 11 : i64} {
  func.func @combiner_kernel(%arg0: memref<16x32xf32, #tpu.memory_space<vmem>>, %arg1: memref<32x96xf32, #tpu.memory_space<vmem>>, %arg2: memref<32x96xf32, #tpu.memory_space<vmem>>, %arg3: memref<1x96xf32, #tpu.memory_space<vmem>>, %arg4: memref<1x32xf32, #tpu.memory_space<vmem>>, %arg5: memref<32x32xf32, #tpu.memory_space<vmem>>, %arg6: memref<1x32xf32, #tpu.memory_space<vmem>>, %arg7: memref<32x32xf32, #tpu.memory_space<vmem>>, %arg8: memref<1x32xf32, #tpu.memory_space<vmem>>, %arg9: memref<32x1xf32, #tpu.memory_space<vmem>>, %arg10: memref<1x1xf32, #tpu.memory_space<vmem>>, %arg11: memref<2x1xf32, #tpu.memory_space<vmem>>) attributes {dimension_semantics = [], scalar_prefetch = 0 : i64, scratch_operands = 0 : i64, tpu.core_type = #tpu.core_type<tc>} {
    %c0 = arith.constant 0 : index
    %c0_0 = arith.constant 0 : index
    %0 = vector.load %arg1[%c0, %c0_0] : memref<32x96xf32, #tpu.memory_space<vmem>>, vector<32x96xf32>
    %c0_1 = arith.constant 0 : index
    %c0_2 = arith.constant 0 : index
    %1 = vector.load %arg2[%c0_1, %c0_2] : memref<32x96xf32, #tpu.memory_space<vmem>>, vector<32x96xf32>
    %c0_3 = arith.constant 0 : index
    %c0_4 = arith.constant 0 : index
    %2 = vector.load %arg0[%c0_3, %c0_4] : memref<16x32xf32, #tpu.memory_space<vmem>>, vector<16x32xf32>
    %cst = arith.constant dense<0.000000e+00> : vector<16x96xf32>
    %3 = tpu.matmul %2, %0, %cst {dimension_numbers = #tpu.dot_dimension_numbers<[1], [0], [0], [1], [0, 0, 1, 1], [], []>} : vector<16x32xf32>, vector<32x96xf32>, vector<16x96xf32> -> vector<16x96xf32>
    %c0_5 = arith.constant 0 : index
    %c0_6 = arith.constant 0 : index
    %4 = vector.load %arg3[%c0_5, %c0_6] : memref<1x96xf32, #tpu.memory_space<vmem>>, vector<1x96xf32>
    %5 = vector.broadcast %4 : vector<1x96xf32> to vector<16x96xf32>
    %6 = arith.addf %3, %5 : vector<16x96xf32>
    %c0_7 = arith.constant 0 : index
    %c0_8 = arith.constant 0 : index
    %7 = vector.load %arg4[%c0_7, %c0_8] : memref<1x32xf32, #tpu.memory_space<vmem>>, vector<1x32xf32>
    %8 = vector.shape_cast %7 : vector<1x32xf32> to vector<1x32xf32>
    %9 = vector.broadcast %8 : vector<1x32xf32> to vector<2x32xf32>
    %cst_9 = arith.constant 0.000000e+00 : f32
    %10 = vector.broadcast %cst_9 : f32 to vector<2x32xf32>
    %11 = vector.extract_strided_slice %6 {offsets = [0, 0], sizes = [2, 96], strides = [1, 1]} : vector<16x96xf32> to vector<2x96xf32>
    %cst_10 = arith.constant dense<0.000000e+00> : vector<2x96xf32>
    %12 = tpu.matmul %10, %1, %cst_10 {dimension_numbers = #tpu.dot_dimension_numbers<[1], [0], [0], [1], [0, 0, 1, 1], [], []>} : vector<2x32xf32>, vector<32x96xf32>, vector<2x96xf32> -> vector<2x96xf32>
    %13 = vector.extract_strided_slice %11 {offsets = [0, 0], sizes = [2, 32], strides = [1, 1]} : vector<2x96xf32> to vector<2x32xf32>
    %14 = vector.extract_strided_slice %12 {offsets = [0, 0], sizes = [2, 32], strides = [1, 1]} : vector<2x96xf32> to vector<2x32xf32>
    %15 = arith.addf %13, %14 : vector<2x32xf32>
    %16 = arith.negf %15 : vector<2x32xf32>
    %17 = math.exp %16 : vector<2x32xf32>
    %cst_11 = arith.constant 1.000000e+00 : f32
    %18 = vector.broadcast %cst_11 : f32 to vector<2x32xf32>
    %19 = arith.addf %18, %17 : vector<2x32xf32>
    %20 = arith.divf %18, %19 : vector<2x32xf32>
    %21 = vector.extract_strided_slice %11 {offsets = [0, 32], sizes = [2, 32], strides = [1, 1]} : vector<2x96xf32> to vector<2x32xf32>
    %22 = vector.extract_strided_slice %12 {offsets = [0, 32], sizes = [2, 32], strides = [1, 1]} : vector<2x96xf32> to vector<2x32xf32>
    %23 = arith.addf %21, %22 : vector<2x32xf32>
    %24 = arith.negf %23 : vector<2x32xf32>
    %25 = math.exp %24 : vector<2x32xf32>
    %cst_12 = arith.constant 1.000000e+00 : f32
    %26 = vector.broadcast %cst_12 : f32 to vector<2x32xf32>
    %27 = arith.addf %26, %25 : vector<2x32xf32>
    %28 = arith.divf %26, %27 : vector<2x32xf32>
    %29 = vector.extract_strided_slice %11 {offsets = [0, 64], sizes = [2, 32], strides = [1, 1]} : vector<2x96xf32> to vector<2x32xf32>
    %30 = vector.extract_strided_slice %12 {offsets = [0, 64], sizes = [2, 32], strides = [1, 1]} : vector<2x96xf32> to vector<2x32xf32>
    %31 = arith.addf %30, %9 : vector<2x32xf32>
    %32 = arith.mulf %20, %31 : vector<2x32xf32>
    %33 = arith.addf %29, %32 : vector<2x32xf32>
    %34 = math.tanh %33 : vector<2x32xf32>
    %35 = arith.subf %10, %34 : vector<2x32xf32>
    %36 = arith.mulf %28, %35 : vector<2x32xf32>
    %37 = arith.addf %34, %36 : vector<2x32xf32>
    %38 = vector.extract_strided_slice %6 {offsets = [2, 0], sizes = [2, 96], strides = [1, 1]} : vector<16x96xf32> to vector<2x96xf32>
    %cst_13 = arith.constant dense<0.000000e+00> : vector<2x96xf32>
    %39 = tpu.matmul %37, %1, %cst_13 {dimension_numbers = #tpu.dot_dimension_numbers<[1], [0], [0], [1], [0, 0, 1, 1], [], []>} : vector<2x32xf32>, vector<32x96xf32>, vector<2x96xf32> -> vector<2x96xf32>
    %40 = vector.extract_strided_slice %38 {offsets = [0, 0], sizes = [2, 32], strides = [1, 1]} : vector<2x96xf32> to vector<2x32xf32>
    %41 = vector.extract_strided_slice %39 {offsets = [0, 0], sizes = [2, 32], strides = [1, 1]} : vector<2x96xf32> to vector<2x32xf32>
    %42 = arith.addf %40, %41 : vector<2x32xf32>
    %43 = arith.negf %42 : vector<2x32xf32>
    %44 = math.exp %43 : vector<2x32xf32>
    %cst_14 = arith.constant 1.000000e+00 : f32
    %45 = vector.broadcast %cst_14 : f32 to vector<2x32xf32>
    %46 = arith.addf %45, %44 : vector<2x32xf32>
    %47 = arith.divf %45, %46 : vector<2x32xf32>
    %48 = vector.extract_strided_slice %38 {offsets = [0, 32], sizes = [2, 32], strides = [1, 1]} : vector<2x96xf32> to vector<2x32xf32>
    %49 = vector.extract_strided_slice %39 {offsets = [0, 32], sizes = [2, 32], strides = [1, 1]} : vector<2x96xf32> to vector<2x32xf32>
    %50 = arith.addf %48, %49 : vector<2x32xf32>
    %51 = arith.negf %50 : vector<2x32xf32>
    %52 = math.exp %51 : vector<2x32xf32>
    %cst_15 = arith.constant 1.000000e+00 : f32
    %53 = vector.broadcast %cst_15 : f32 to vector<2x32xf32>
    %54 = arith.addf %53, %52 : vector<2x32xf32>
    %55 = arith.divf %53, %54 : vector<2x32xf32>
    %56 = vector.extract_strided_slice %38 {offsets = [0, 64], sizes = [2, 32], strides = [1, 1]} : vector<2x96xf32> to vector<2x32xf32>
    %57 = vector.extract_strided_slice %39 {offsets = [0, 64], sizes = [2, 32], strides = [1, 1]} : vector<2x96xf32> to vector<2x32xf32>
    %58 = arith.addf %57, %9 : vector<2x32xf32>
    %59 = arith.mulf %47, %58 : vector<2x32xf32>
    %60 = arith.addf %56, %59 : vector<2x32xf32>
    %61 = math.tanh %60 : vector<2x32xf32>
    %62 = arith.subf %37, %61 : vector<2x32xf32>
    %63 = arith.mulf %55, %62 : vector<2x32xf32>
    %64 = arith.addf %61, %63 : vector<2x32xf32>
    %65 = vector.extract_strided_slice %6 {offsets = [4, 0], sizes = [2, 96], strides = [1, 1]} : vector<16x96xf32> to vector<2x96xf32>
    %cst_16 = arith.constant dense<0.000000e+00> : vector<2x96xf32>
    %66 = tpu.matmul %64, %1, %cst_16 {dimension_numbers = #tpu.dot_dimension_numbers<[1], [0], [0], [1], [0, 0, 1, 1], [], []>} : vector<2x32xf32>, vector<32x96xf32>, vector<2x96xf32> -> vector<2x96xf32>
    %67 = vector.extract_strided_slice %65 {offsets = [0, 0], sizes = [2, 32], strides = [1, 1]} : vector<2x96xf32> to vector<2x32xf32>
    %68 = vector.extract_strided_slice %66 {offsets = [0, 0], sizes = [2, 32], strides = [1, 1]} : vector<2x96xf32> to vector<2x32xf32>
    %69 = arith.addf %67, %68 : vector<2x32xf32>
    %70 = arith.negf %69 : vector<2x32xf32>
    %71 = math.exp %70 : vector<2x32xf32>
    %cst_17 = arith.constant 1.000000e+00 : f32
    %72 = vector.broadcast %cst_17 : f32 to vector<2x32xf32>
    %73 = arith.addf %72, %71 : vector<2x32xf32>
    %74 = arith.divf %72, %73 : vector<2x32xf32>
    %75 = vector.extract_strided_slice %65 {offsets = [0, 32], sizes = [2, 32], strides = [1, 1]} : vector<2x96xf32> to vector<2x32xf32>
    %76 = vector.extract_strided_slice %66 {offsets = [0, 32], sizes = [2, 32], strides = [1, 1]} : vector<2x96xf32> to vector<2x32xf32>
    %77 = arith.addf %75, %76 : vector<2x32xf32>
    %78 = arith.negf %77 : vector<2x32xf32>
    %79 = math.exp %78 : vector<2x32xf32>
    %cst_18 = arith.constant 1.000000e+00 : f32
    %80 = vector.broadcast %cst_18 : f32 to vector<2x32xf32>
    %81 = arith.addf %80, %79 : vector<2x32xf32>
    %82 = arith.divf %80, %81 : vector<2x32xf32>
    %83 = vector.extract_strided_slice %65 {offsets = [0, 64], sizes = [2, 32], strides = [1, 1]} : vector<2x96xf32> to vector<2x32xf32>
    %84 = vector.extract_strided_slice %66 {offsets = [0, 64], sizes = [2, 32], strides = [1, 1]} : vector<2x96xf32> to vector<2x32xf32>
    %85 = arith.addf %84, %9 : vector<2x32xf32>
    %86 = arith.mulf %74, %85 : vector<2x32xf32>
    %87 = arith.addf %83, %86 : vector<2x32xf32>
    %88 = math.tanh %87 : vector<2x32xf32>
    %89 = arith.subf %64, %88 : vector<2x32xf32>
    %90 = arith.mulf %82, %89 : vector<2x32xf32>
    %91 = arith.addf %88, %90 : vector<2x32xf32>
    %92 = vector.extract_strided_slice %6 {offsets = [6, 0], sizes = [2, 96], strides = [1, 1]} : vector<16x96xf32> to vector<2x96xf32>
    %cst_19 = arith.constant dense<0.000000e+00> : vector<2x96xf32>
    %93 = tpu.matmul %91, %1, %cst_19 {dimension_numbers = #tpu.dot_dimension_numbers<[1], [0], [0], [1], [0, 0, 1, 1], [], []>} : vector<2x32xf32>, vector<32x96xf32>, vector<2x96xf32> -> vector<2x96xf32>
    %94 = vector.extract_strided_slice %92 {offsets = [0, 0], sizes = [2, 32], strides = [1, 1]} : vector<2x96xf32> to vector<2x32xf32>
    %95 = vector.extract_strided_slice %93 {offsets = [0, 0], sizes = [2, 32], strides = [1, 1]} : vector<2x96xf32> to vector<2x32xf32>
    %96 = arith.addf %94, %95 : vector<2x32xf32>
    %97 = arith.negf %96 : vector<2x32xf32>
    %98 = math.exp %97 : vector<2x32xf32>
    %cst_20 = arith.constant 1.000000e+00 : f32
    %99 = vector.broadcast %cst_20 : f32 to vector<2x32xf32>
    %100 = arith.addf %99, %98 : vector<2x32xf32>
    %101 = arith.divf %99, %100 : vector<2x32xf32>
    %102 = vector.extract_strided_slice %92 {offsets = [0, 32], sizes = [2, 32], strides = [1, 1]} : vector<2x96xf32> to vector<2x32xf32>
    %103 = vector.extract_strided_slice %93 {offsets = [0, 32], sizes = [2, 32], strides = [1, 1]} : vector<2x96xf32> to vector<2x32xf32>
    %104 = arith.addf %102, %103 : vector<2x32xf32>
    %105 = arith.negf %104 : vector<2x32xf32>
    %106 = math.exp %105 : vector<2x32xf32>
    %cst_21 = arith.constant 1.000000e+00 : f32
    %107 = vector.broadcast %cst_21 : f32 to vector<2x32xf32>
    %108 = arith.addf %107, %106 : vector<2x32xf32>
    %109 = arith.divf %107, %108 : vector<2x32xf32>
    %110 = vector.extract_strided_slice %92 {offsets = [0, 64], sizes = [2, 32], strides = [1, 1]} : vector<2x96xf32> to vector<2x32xf32>
    %111 = vector.extract_strided_slice %93 {offsets = [0, 64], sizes = [2, 32], strides = [1, 1]} : vector<2x96xf32> to vector<2x32xf32>
    %112 = arith.addf %111, %9 : vector<2x32xf32>
    %113 = arith.mulf %101, %112 : vector<2x32xf32>
    %114 = arith.addf %110, %113 : vector<2x32xf32>
    %115 = math.tanh %114 : vector<2x32xf32>
    %116 = arith.subf %91, %115 : vector<2x32xf32>
    %117 = arith.mulf %109, %116 : vector<2x32xf32>
    %118 = arith.addf %115, %117 : vector<2x32xf32>
    %119 = vector.extract_strided_slice %6 {offsets = [8, 0], sizes = [2, 96], strides = [1, 1]} : vector<16x96xf32> to vector<2x96xf32>
    %cst_22 = arith.constant dense<0.000000e+00> : vector<2x96xf32>
    %120 = tpu.matmul %118, %1, %cst_22 {dimension_numbers = #tpu.dot_dimension_numbers<[1], [0], [0], [1], [0, 0, 1, 1], [], []>} : vector<2x32xf32>, vector<32x96xf32>, vector<2x96xf32> -> vector<2x96xf32>
    %121 = vector.extract_strided_slice %119 {offsets = [0, 0], sizes = [2, 32], strides = [1, 1]} : vector<2x96xf32> to vector<2x32xf32>
    %122 = vector.extract_strided_slice %120 {offsets = [0, 0], sizes = [2, 32], strides = [1, 1]} : vector<2x96xf32> to vector<2x32xf32>
    %123 = arith.addf %121, %122 : vector<2x32xf32>
    %124 = arith.negf %123 : vector<2x32xf32>
    %125 = math.exp %124 : vector<2x32xf32>
    %cst_23 = arith.constant 1.000000e+00 : f32
    %126 = vector.broadcast %cst_23 : f32 to vector<2x32xf32>
    %127 = arith.addf %126, %125 : vector<2x32xf32>
    %128 = arith.divf %126, %127 : vector<2x32xf32>
    %129 = vector.extract_strided_slice %119 {offsets = [0, 32], sizes = [2, 32], strides = [1, 1]} : vector<2x96xf32> to vector<2x32xf32>
    %130 = vector.extract_strided_slice %120 {offsets = [0, 32], sizes = [2, 32], strides = [1, 1]} : vector<2x96xf32> to vector<2x32xf32>
    %131 = arith.addf %129, %130 : vector<2x32xf32>
    %132 = arith.negf %131 : vector<2x32xf32>
    %133 = math.exp %132 : vector<2x32xf32>
    %cst_24 = arith.constant 1.000000e+00 : f32
    %134 = vector.broadcast %cst_24 : f32 to vector<2x32xf32>
    %135 = arith.addf %134, %133 : vector<2x32xf32>
    %136 = arith.divf %134, %135 : vector<2x32xf32>
    %137 = vector.extract_strided_slice %119 {offsets = [0, 64], sizes = [2, 32], strides = [1, 1]} : vector<2x96xf32> to vector<2x32xf32>
    %138 = vector.extract_strided_slice %120 {offsets = [0, 64], sizes = [2, 32], strides = [1, 1]} : vector<2x96xf32> to vector<2x32xf32>
    %139 = arith.addf %138, %9 : vector<2x32xf32>
    %140 = arith.mulf %128, %139 : vector<2x32xf32>
    %141 = arith.addf %137, %140 : vector<2x32xf32>
    %142 = math.tanh %141 : vector<2x32xf32>
    %143 = arith.subf %118, %142 : vector<2x32xf32>
    %144 = arith.mulf %136, %143 : vector<2x32xf32>
    %145 = arith.addf %142, %144 : vector<2x32xf32>
    %146 = vector.extract_strided_slice %6 {offsets = [10, 0], sizes = [2, 96], strides = [1, 1]} : vector<16x96xf32> to vector<2x96xf32>
    %cst_25 = arith.constant dense<0.000000e+00> : vector<2x96xf32>
    %147 = tpu.matmul %145, %1, %cst_25 {dimension_numbers = #tpu.dot_dimension_numbers<[1], [0], [0], [1], [0, 0, 1, 1], [], []>} : vector<2x32xf32>, vector<32x96xf32>, vector<2x96xf32> -> vector<2x96xf32>
    %148 = vector.extract_strided_slice %146 {offsets = [0, 0], sizes = [2, 32], strides = [1, 1]} : vector<2x96xf32> to vector<2x32xf32>
    %149 = vector.extract_strided_slice %147 {offsets = [0, 0], sizes = [2, 32], strides = [1, 1]} : vector<2x96xf32> to vector<2x32xf32>
    %150 = arith.addf %148, %149 : vector<2x32xf32>
    %151 = arith.negf %150 : vector<2x32xf32>
    %152 = math.exp %151 : vector<2x32xf32>
    %cst_26 = arith.constant 1.000000e+00 : f32
    %153 = vector.broadcast %cst_26 : f32 to vector<2x32xf32>
    %154 = arith.addf %153, %152 : vector<2x32xf32>
    %155 = arith.divf %153, %154 : vector<2x32xf32>
    %156 = vector.extract_strided_slice %146 {offsets = [0, 32], sizes = [2, 32], strides = [1, 1]} : vector<2x96xf32> to vector<2x32xf32>
    %157 = vector.extract_strided_slice %147 {offsets = [0, 32], sizes = [2, 32], strides = [1, 1]} : vector<2x96xf32> to vector<2x32xf32>
    %158 = arith.addf %156, %157 : vector<2x32xf32>
    %159 = arith.negf %158 : vector<2x32xf32>
    %160 = math.exp %159 : vector<2x32xf32>
    %cst_27 = arith.constant 1.000000e+00 : f32
    %161 = vector.broadcast %cst_27 : f32 to vector<2x32xf32>
    %162 = arith.addf %161, %160 : vector<2x32xf32>
    %163 = arith.divf %161, %162 : vector<2x32xf32>
    %164 = vector.extract_strided_slice %146 {offsets = [0, 64], sizes = [2, 32], strides = [1, 1]} : vector<2x96xf32> to vector<2x32xf32>
    %165 = vector.extract_strided_slice %147 {offsets = [0, 64], sizes = [2, 32], strides = [1, 1]} : vector<2x96xf32> to vector<2x32xf32>
    %166 = arith.addf %165, %9 : vector<2x32xf32>
    %167 = arith.mulf %155, %166 : vector<2x32xf32>
    %168 = arith.addf %164, %167 : vector<2x32xf32>
    %169 = math.tanh %168 : vector<2x32xf32>
    %170 = arith.subf %145, %169 : vector<2x32xf32>
    %171 = arith.mulf %163, %170 : vector<2x32xf32>
    %172 = arith.addf %169, %171 : vector<2x32xf32>
    %173 = vector.extract_strided_slice %6 {offsets = [12, 0], sizes = [2, 96], strides = [1, 1]} : vector<16x96xf32> to vector<2x96xf32>
    %cst_28 = arith.constant dense<0.000000e+00> : vector<2x96xf32>
    %174 = tpu.matmul %172, %1, %cst_28 {dimension_numbers = #tpu.dot_dimension_numbers<[1], [0], [0], [1], [0, 0, 1, 1], [], []>} : vector<2x32xf32>, vector<32x96xf32>, vector<2x96xf32> -> vector<2x96xf32>
    %175 = vector.extract_strided_slice %173 {offsets = [0, 0], sizes = [2, 32], strides = [1, 1]} : vector<2x96xf32> to vector<2x32xf32>
    %176 = vector.extract_strided_slice %174 {offsets = [0, 0], sizes = [2, 32], strides = [1, 1]} : vector<2x96xf32> to vector<2x32xf32>
    %177 = arith.addf %175, %176 : vector<2x32xf32>
    %178 = arith.negf %177 : vector<2x32xf32>
    %179 = math.exp %178 : vector<2x32xf32>
    %cst_29 = arith.constant 1.000000e+00 : f32
    %180 = vector.broadcast %cst_29 : f32 to vector<2x32xf32>
    %181 = arith.addf %180, %179 : vector<2x32xf32>
    %182 = arith.divf %180, %181 : vector<2x32xf32>
    %183 = vector.extract_strided_slice %173 {offsets = [0, 32], sizes = [2, 32], strides = [1, 1]} : vector<2x96xf32> to vector<2x32xf32>
    %184 = vector.extract_strided_slice %174 {offsets = [0, 32], sizes = [2, 32], strides = [1, 1]} : vector<2x96xf32> to vector<2x32xf32>
    %185 = arith.addf %183, %184 : vector<2x32xf32>
    %186 = arith.negf %185 : vector<2x32xf32>
    %187 = math.exp %186 : vector<2x32xf32>
    %cst_30 = arith.constant 1.000000e+00 : f32
    %188 = vector.broadcast %cst_30 : f32 to vector<2x32xf32>
    %189 = arith.addf %188, %187 : vector<2x32xf32>
    %190 = arith.divf %188, %189 : vector<2x32xf32>
    %191 = vector.extract_strided_slice %173 {offsets = [0, 64], sizes = [2, 32], strides = [1, 1]} : vector<2x96xf32> to vector<2x32xf32>
    %192 = vector.extract_strided_slice %174 {offsets = [0, 64], sizes = [2, 32], strides = [1, 1]} : vector<2x96xf32> to vector<2x32xf32>
    %193 = arith.addf %192, %9 : vector<2x32xf32>
    %194 = arith.mulf %182, %193 : vector<2x32xf32>
    %195 = arith.addf %191, %194 : vector<2x32xf32>
    %196 = math.tanh %195 : vector<2x32xf32>
    %197 = arith.subf %172, %196 : vector<2x32xf32>
    %198 = arith.mulf %190, %197 : vector<2x32xf32>
    %199 = arith.addf %196, %198 : vector<2x32xf32>
    %200 = vector.extract_strided_slice %6 {offsets = [14, 0], sizes = [2, 96], strides = [1, 1]} : vector<16x96xf32> to vector<2x96xf32>
    %cst_31 = arith.constant dense<0.000000e+00> : vector<2x96xf32>
    %201 = tpu.matmul %199, %1, %cst_31 {dimension_numbers = #tpu.dot_dimension_numbers<[1], [0], [0], [1], [0, 0, 1, 1], [], []>} : vector<2x32xf32>, vector<32x96xf32>, vector<2x96xf32> -> vector<2x96xf32>
    %202 = vector.extract_strided_slice %200 {offsets = [0, 0], sizes = [2, 32], strides = [1, 1]} : vector<2x96xf32> to vector<2x32xf32>
    %203 = vector.extract_strided_slice %201 {offsets = [0, 0], sizes = [2, 32], strides = [1, 1]} : vector<2x96xf32> to vector<2x32xf32>
    %204 = arith.addf %202, %203 : vector<2x32xf32>
    %205 = arith.negf %204 : vector<2x32xf32>
    %206 = math.exp %205 : vector<2x32xf32>
    %cst_32 = arith.constant 1.000000e+00 : f32
    %207 = vector.broadcast %cst_32 : f32 to vector<2x32xf32>
    %208 = arith.addf %207, %206 : vector<2x32xf32>
    %209 = arith.divf %207, %208 : vector<2x32xf32>
    %210 = vector.extract_strided_slice %200 {offsets = [0, 32], sizes = [2, 32], strides = [1, 1]} : vector<2x96xf32> to vector<2x32xf32>
    %211 = vector.extract_strided_slice %201 {offsets = [0, 32], sizes = [2, 32], strides = [1, 1]} : vector<2x96xf32> to vector<2x32xf32>
    %212 = arith.addf %210, %211 : vector<2x32xf32>
    %213 = arith.negf %212 : vector<2x32xf32>
    %214 = math.exp %213 : vector<2x32xf32>
    %cst_33 = arith.constant 1.000000e+00 : f32
    %215 = vector.broadcast %cst_33 : f32 to vector<2x32xf32>
    %216 = arith.addf %215, %214 : vector<2x32xf32>
    %217 = arith.divf %215, %216 : vector<2x32xf32>
    %218 = vector.extract_strided_slice %200 {offsets = [0, 64], sizes = [2, 32], strides = [1, 1]} : vector<2x96xf32> to vector<2x32xf32>
    %219 = vector.extract_strided_slice %201 {offsets = [0, 64], sizes = [2, 32], strides = [1, 1]} : vector<2x96xf32> to vector<2x32xf32>
    %220 = arith.addf %219, %9 : vector<2x32xf32>
    %221 = arith.mulf %209, %220 : vector<2x32xf32>
    %222 = arith.addf %218, %221 : vector<2x32xf32>
    %223 = math.tanh %222 : vector<2x32xf32>
    %224 = arith.subf %199, %223 : vector<2x32xf32>
    %225 = arith.mulf %217, %224 : vector<2x32xf32>
    %226 = arith.addf %223, %225 : vector<2x32xf32>
    %c0_34 = arith.constant 0 : index
    %c0_35 = arith.constant 0 : index
    %227 = vector.load %arg5[%c0_34, %c0_35] : memref<32x32xf32, #tpu.memory_space<vmem>>, vector<32x32xf32>
    %cst_36 = arith.constant dense<0.000000e+00> : vector<2x32xf32>
    %228 = tpu.matmul %226, %227, %cst_36 {dimension_numbers = #tpu.dot_dimension_numbers<[1], [0], [0], [1], [0, 0, 1, 1], [], []>} : vector<2x32xf32>, vector<32x32xf32>, vector<2x32xf32> -> vector<2x32xf32>
    %c0_37 = arith.constant 0 : index
    %c0_38 = arith.constant 0 : index
    %229 = vector.load %arg6[%c0_37, %c0_38] : memref<1x32xf32, #tpu.memory_space<vmem>>, vector<1x32xf32>
    %230 = vector.broadcast %229 : vector<1x32xf32> to vector<2x32xf32>
    %231 = arith.addf %228, %230 : vector<2x32xf32>
    %cst_39 = arith.constant 0.000000e+00 : f32
    %232 = vector.broadcast %cst_39 : f32 to vector<2x32xf32>
    %233 = arith.maximumf %231, %232 : vector<2x32xf32>
    %c0_40 = arith.constant 0 : index
    %c0_41 = arith.constant 0 : index
    %234 = vector.load %arg7[%c0_40, %c0_41] : memref<32x32xf32, #tpu.memory_space<vmem>>, vector<32x32xf32>
    %cst_42 = arith.constant dense<0.000000e+00> : vector<2x32xf32>
    %235 = tpu.matmul %233, %234, %cst_42 {dimension_numbers = #tpu.dot_dimension_numbers<[1], [0], [0], [1], [0, 0, 1, 1], [], []>} : vector<2x32xf32>, vector<32x32xf32>, vector<2x32xf32> -> vector<2x32xf32>
    %c0_43 = arith.constant 0 : index
    %c0_44 = arith.constant 0 : index
    %236 = vector.load %arg8[%c0_43, %c0_44] : memref<1x32xf32, #tpu.memory_space<vmem>>, vector<1x32xf32>
    %237 = vector.broadcast %236 : vector<1x32xf32> to vector<2x32xf32>
    %238 = arith.addf %235, %237 : vector<2x32xf32>
    %cst_45 = arith.constant 0.000000e+00 : f32
    %239 = vector.broadcast %cst_45 : f32 to vector<2x32xf32>
    %240 = arith.maximumf %238, %239 : vector<2x32xf32>
    %c0_46 = arith.constant 0 : index
    %c0_47 = arith.constant 0 : index
    %241 = vector.load %arg9[%c0_46, %c0_47] : memref<32x1xf32, #tpu.memory_space<vmem>>, vector<32x1xf32>
    %cst_48 = arith.constant dense<0.000000e+00> : vector<2x1xf32>
    %242 = tpu.matmul %240, %241, %cst_48 {dimension_numbers = #tpu.dot_dimension_numbers<[1], [0], [0], [1], [0, 0, 1, 1], [], []>} : vector<2x32xf32>, vector<32x1xf32>, vector<2x1xf32> -> vector<2x1xf32>
    %c0_49 = arith.constant 0 : index
    %c0_50 = arith.constant 0 : index
    %243 = vector.load %arg10[%c0_49, %c0_50] : memref<1x1xf32, #tpu.memory_space<vmem>>, vector<1x1xf32>
    %244 = vector.broadcast %243 : vector<1x1xf32> to vector<2x1xf32>
    %245 = arith.addf %242, %244 : vector<2x1xf32>
    %246 = arith.negf %245 : vector<2x1xf32>
    %247 = math.exp %246 : vector<2x1xf32>
    %cst_51 = arith.constant 1.000000e+00 : f32
    %248 = vector.broadcast %cst_51 : f32 to vector<2x1xf32>
    %249 = arith.addf %248, %247 : vector<2x1xf32>
    %250 = arith.divf %248, %249 : vector<2x1xf32>
    %c0_52 = arith.constant 0 : index
    %c0_53 = arith.constant 0 : index
    %251 = vector.load %arg11[%c0_52, %c0_53] : memref<2x1xf32, #tpu.memory_space<vmem>>, vector<2x1xf32>
    tpu.vector_store %arg11[%c0_52, %c0_53], %250 {strides = array<i32>} : memref<2x1xf32, #tpu.memory_space<vmem>>, vector<2x1xf32>,
    return
  }
}

</mosaic_0001>

<bundles_post_ra>
// kernel: tpu_custom_call.1
= control target key start
LH: loop header
LB: loop body
LE: loop exit
PB: predicated region body
PF: predicated region fallthrough
CT: control target
= control target key end

     0   :  { %s2157_s0 = inlined_call_operand.hbm [shape: f32[16,32], index: 0, kind: input, shape index: {}]   ;;  %s2158_s1 = inlined_call_operand.vmem [shape: f32[32,96], index: 1, kind: input, shape index: {}]   ;;  %s2159_s2 = inlined_call_operand.hbm [shape: f32[32,96], index: 2, kind: input, shape index: {}]   ;;  %s2160_s3 = inlined_call_operand.vmem [shape: f32[1,96], index: 3, kind: input, shape index: {}]   ;;  %s2161_s4 = inlined_call_operand.vmem [shape: f32[1,32], index: 4, kind: input, shape index: {}]   ;;  %s2162_s5 = inlined_call_operand.hbm [shape: f32[32,32], index: 5, kind: input, shape index: {}]   ;;  %s2163_s6 = inlined_call_operand.vmem [shape: f32[1,32], index: 6, kind: input, shape index: {}]   ;;  %s2164_s7 = inlined_call_operand.hbm [shape: f32[32,32], index: 7, kind: input, shape index: {}]   ;;  %s2165_s8 = inlined_call_operand.vmem [shape: f32[1,32], index: 8, kind: input, shape index: {}]   ;;  %s2166_s9 = inlined_call_operand.vmem [shape: f32[32,1], index: 9, kind: input, shape index: {}]   ;;  %s2167_s10 = inlined_call_operand.<no memory space> [shape: f32[1,1], index: 10, kind: input, shape index: {}]   ;;  %s2168_s11 = inlined_call_operand.vmem [shape: f32[2,1], index: 11, kind: output, shape index: {}]  }
   0x1   :  { %v16_v0 = vstv %s2167_s10 }
   0x2   :  { %17 = vst [vmem:[#allocation2] sm:$0x1] %v16_v0 }
   0x3   :  { %18 = vsyncpa [#allocation4], 0 }
   0x4   :  { %19 = vsyncpa [#allocation6], 0 }
   0x5   :  { %20 = vsyncpa [#allocation9], 0  ;;  %s1821_s19 = smov [#allocation5]   ;;  %s1822_s21 = smov [#allocation3]  }
   0x6   :  { %s40_s20 = sshll.u32 %s1821_s19, 4  ;;  %s26_s22 = sshll.u32 %s1822_s21, 4  ;;  %s41_s20 = int_to_ptr.vmem [resolvable:$true] %s40_s20  ;;  %s1896_s22 = int_to_ptr.vmem [resolvable:$true] %s26_s22 }
   0x7   :  { %s1727_s25 = scalar_lea.hbm %s2159_s2, 512 }
   0x8   :  { %p1728_p0 = scmp.ne.s32.totalorder %s2159_s2, %s1727_s25  ;;  %p1731_p1 = scmp.lt.u32.totalorder %s1727_s25, %s2159_s2 }
   0xa   :  { %p1733_p2 = pnand %p1731_p1, %p1728_p0 }
   0xc   :  { %1736 = shalt.err (!%p1733_p2)
}
   0xd   :  { %s1737_s29 = scalar_lea.vmem %s41_s20, 512  ;;  %p1742_p4 = scmp.lt.s32.totalorder %s41_s20, %s41_s20 }
   0xe   :  { %p1738_p3 = scmp.ne.s32.totalorder %s41_s20, %s1737_s29  ;;  %p1743_p5 = scmp.lt.s32.totalorder %s1737_s29, %s1737_s29 }
  0x10   :  { %p1744_p6 = por %p1743_p5, %p1742_p4 }
  0x12   :  { %p1745_p7 = pnand %p1744_p6, %p1738_p3 }
  0x14   :  { %1748 = shalt.err (!%p1745_p7)
}
  0x15   :  { %s1823_s30 = smov 128   ;;  %s1824_s12 = smov 8  }
  0x16   :  { %46 = dma.hbm_to_vmem [thread:$0]  %s2159_s2, 512, %s41_s20, [#allocation6], %s1823_s30, %s1823_s30, %s1824_s12  }
  0x17   :  { %s1749_s17 = scalar_lea.hbm %s2157_s0, 256 }
  0x18   :  { %p1750_p8 = scmp.ne.s32.totalorder %s2157_s0, %s1749_s17  ;;  %p1753_p9 = scmp.lt.u32.totalorder %s1749_s17, %s2157_s0 }
  0x1a   :  { %p1755_p10 = pnand %p1753_p9, %p1750_p8 }
  0x1c   :  { %1758 = shalt.err (!%p1755_p10)
}
  0x1d   :  { %s1759_s24 = scalar_lea.vmem %s1896_s22, 256  ;;  %p1764_p12 = scmp.lt.s32.totalorder %s1896_s22, %s1896_s22 }
  0x1e   :  { %p1760_p11 = scmp.ne.s32.totalorder %s1896_s22, %s1759_s24  ;;  %p1765_p13 = scmp.lt.s32.totalorder %s1759_s24, %s1759_s24 }
  0x20   :  { %p1766_p0 = por %p1765_p13, %p1764_p12 }
  0x22   :  { %p1767_p1 = pnand %p1766_p0, %p1760_p11 }
  0x24   :  { %1770 = shalt.err (!%p1767_p1)
}
  0x25   :  { %32 = dma.hbm_to_vmem [thread:$0]  %s2157_s0, 256, %s1896_s22, [#allocation4], %s1823_s30, %s1823_s30, %s1824_s12  }
  0x26   :  { %s1825_s25 = smov [#allocation7]   ;;  %s1826_s27 = smov [#allocation8]  }
  0x27   :  { %s56_s26 = sshll.u32 %s1825_s25, 4  ;;  %s70_s10 = sshll.u32 %s1826_s27, 4  ;;  %s57_s26 = int_to_ptr.vmem [resolvable:$true] %s56_s26  ;;  %s1933_s10 = int_to_ptr.vmem [resolvable:$true] %s70_s10 }
  0x28   :  { %s1771_s13 = scalar_lea.hbm %s2162_s5, 512 }
  0x29   :  { %p1772_p2 = scmp.ne.s32.totalorder %s2162_s5, %s1771_s13  ;;  %p1775_p3 = scmp.lt.u32.totalorder %s1771_s13, %s2162_s5 }
  0x2b   :  { %p1777_p4 = pnand %p1775_p3, %p1772_p2 }
  0x2d   :  { %1780 = shalt.err (!%p1777_p4)
}
  0x2e   :  { %s1781_s0 = scalar_lea.vmem %s57_s26, 512  ;;  %p1786_p6 = scmp.lt.s32.totalorder %s57_s26, %s57_s26 }
  0x2f   :  { %p1782_p5 = scmp.ne.s32.totalorder %s57_s26, %s1781_s0  ;;  %p1787_p7 = scmp.lt.s32.totalorder %s1781_s0, %s1781_s0 }
  0x31   :  { %p1788_p8 = por %p1787_p7, %p1786_p6 }
  0x33   :  { %p1789_p9 = pnand %p1788_p8, %p1782_p5 }
  0x35   :  { %1792 = shalt.err (!%p1789_p9)
}
  0x36   :  { %62 = dma.hbm_to_vmem [thread:$0]  %s2162_s5, 512, %s57_s26, [#allocation6], %s1823_s30, %s1823_s30, %s1824_s12  }
  0x37   :  { %s1793_s23 = scalar_lea.hbm %s2164_s7, 512 }
  0x38   :  { %p1794_p10 = scmp.ne.s32.totalorder %s2164_s7, %s1793_s23  ;;  %p1797_p11 = scmp.lt.u32.totalorder %s1793_s23, %s2164_s7 }
  0x3a   :  { %p1799_p12 = pnand %p1797_p11, %p1794_p10 }
  0x3c   :  { %1802 = shalt.err (!%p1799_p12)
}
  0x3d   :  { %s1803_s27 = scalar_lea.vmem %s1933_s10, 512  ;;  %p1808_p0 = scmp.lt.s32.totalorder %s1933_s10, %s1933_s10 }
  0x3e   :  { %p1804_p13 = scmp.ne.s32.totalorder %s1933_s10, %s1803_s27  ;;  %p1809_p1 = scmp.lt.s32.totalorder %s1803_s27, %s1803_s27 }
  0x40   :  { %p1810_p2 = por %p1809_p1, %p1808_p0 }
  0x42   :  { %p1811_p3 = pnand %p1810_p2, %p1804_p13 }
  0x44   :  { %1814 = shalt.err (!%p1811_p3)
}
  0x45   :  { %76 = dma.hbm_to_vmem [thread:$0]  %s2164_s7, 512, %s1933_s10, [#allocation9], %s1823_s30, %s1823_s30, %s1824_s12  }
  0x46   :  { %1815 = dma.done.wait [#allocation4], 256  }
  0x47   :  { %1816 = vsyncadd [#allocation4], 4294967040 }
  0x48   :  { %1817 = dma.done.wait [#allocation6], 1024  }
  0x49   :  { %1818 = vsyncadd [#allocation6], 4294966272 }
  0x4a   :  { %1819 = dma.done.wait [#allocation9], 512  }
  0x4b   :  { %1820 = vsyncadd [#allocation9], 4294966784  ;;  %v1827_v1 = vmov 0.0|0.0   ;;  %vm1828_vm0 = vmmov 0   ;;  %v1829_v2 = vmov 0.0   ;;  %v95_v3 = vld [vmem:[%s2158_s1] sm:$0xff] }
  0x4c   :  { %1597 = vmatprep.subr.bf16.mxu1 %v1827_v1  ;;  %1476 = vmatprep.mubr.msk.f32.mxu1 %vm1828_vm0, %v1829_v2  ;;  %v96_v4 = vld [vmem:[%s2158_s1 + $0x8] sm:$0xff]  ;;  %v99_v5 = vld [vmem:[#allocation5] sm:$0xff]  ;;  %vm112_vm1 = vcmask 261120   ;;  %v100_v7 = vld [vmem:[#allocation5 + $0x8] sm:$0xff]  ;;  %s1832_s0 = smov 32   ;;  %vm1361_vm2 = vcmask 1024  }
  0x4d   :  { %v1589_v6 = vpack.c.bf16 %v96_v4, %v95_v3  ;;  %v97_v8 = vld [vmem:[%s2158_s1 + $0x10] sm:$0xff]  ;;  %v98_v9 = vld [vmem:[%s2158_s1 + $0x18] sm:$0xff]  ;;  %v1985_v10 = vpack.c.bf16 %v100_v7, %v99_v5  ;;  %v101_v12 = vld [vmem:[#allocation5 + $0x10] sm:$0xff]  ;;  %s1830_s1 = smov 64  }
  0x4e   :  { %v1593_v11 = vpack.c.bf16 %v98_v9, %v97_v8  ;;  %v102_v13 = vld [vmem:[#allocation5 + $0x18] sm:$0xff]  ;;  %v103_v14 = vld [vmem:[#allocation3] sm:$0xff]  ;;  %v1373_v15 = vld [vmem:[%s2161_s4] ss:$0 sm:$0xff] }
  0x4f   :  { %1590 = vmatprep.subr.bf16.mxu0 %v1589_v6  ;;  %1465 = vmatprep.mubr.msk.f32.mxu0 %vm112_vm1, %v103_v14  ;;  %v1992_v16 = vpack.c.bf16 %v102_v13, %v101_v12  ;;  %v104_v17 = vld [vmem:[#allocation3 + $0x8] sm:$0xff]  ;;  %v1370_v21 = vld [vmem:[%s2160_s3] ss:$0 sm:$0xff]  ;;  %s1831_s3 = smov 96  }
  0x50   :  { %1599 = vmatpush3.bf16.msra.mxu1 %v1985_v10  ;;  %1592 = vmatpush3.bf16.msra.mxu0 %v1589_v6 }
  0x51   :  { %1600 = vmatprep.subr.bf16.mxu1 %v1827_v1  ;;  %1594 = vmatprep.subr.bf16.mxu0 %v1593_v11 }
  0x52   :  { %280 = vrot.lane.b32.xlu0 %v1373_v15, %s1830_s1 }
  0x54   :  { %1602 = vmatpush3.bf16.msra.mxu1 %v1992_v16  ;;  %1596 = vmatpush3.bf16.msra.mxu0 %v1593_v11 }
  0x55   :  { %1603 = vmatprep.subr.bf16.mxu0 %v1827_v1  ;;  %1609 = vmatprep.subr.bf16.mxu1 %v1827_v1 }
  0x57   :  { %1477 = vmatmul.mubr.f32.vlgmr.msra.gmra.mrb[0].mxu1 %v1829_v2  ;;  %1466 = vmatmul.mubr.msk.f32.vlgmr.msra.gmra.mrb[0].mxu0 %vm112_vm1, %v104_v17 }
  0x58   :  { %1605 = vmatpush3.bf16.msra.mxu0 %v1985_v10  ;;  %1487 = vmatprep.mubr.msk.f32.mxu0 %vm1828_vm0, %v1829_v2 }
  0x59   :  { %1606 = vmatprep.subr.bf16.mxu0 %v1827_v1  ;;  %1611 = vmatpush3.bf16.msra.mxu1 %v1985_v10 }
  0x5a   :  { %1612 = vmatprep.subr.bf16.mxu1 %v1827_v1  ;;  %1498 = vmatprep.mubr.msk.f32.mxu1 %vm1828_vm0, %v1829_v2 }
  0x5c   :  { %1608 = vmatpush3.bf16.msra.mxu0 %v1992_v16 }
  0x5d   :  { %1614 = vmatpush3.bf16.msra.mxu1 %v1992_v16  ;;  %1615 = vmatprep.subr.bf16.mxu0 %v1827_v1 }
  0x5e   :  { %1621 = vmatprep.subr.bf16.mxu1 %v1827_v1 }
  0xc4   :  { %v2013_v18 = vpop.permute.xlu0 %280 }
 0x12a   :  { %v269_v19 = vpop.f32.mrb[0].mxu1  ;;  %v1467_v20 = vpop.f32.mrb[0].mxu0 }
 0x12b   :  { %v283_v22 = vadd.f32 %v2013_v18, %v269_v19  ;;  %v2019_v23 = vadd.f32 %v1467_v20, %v1370_v21  ;;  %v1478_v24 = vpop.f32.mrb[1].mxu1  ;;  %v185_v25 = vpop.f32.mrb[1].mxu0 }
 0x12c   :  { %v2022_v26 = vadd.f32 %v1370_v21, %v185_v25 }
 0x12d   :  { %285 = vrot.lane.b32.xlu0 %v283_v22, %s1830_s1 }
 0x12e   :  { %v273_v27 = vadd.f32 %v269_v19, %v2022_v26 }
 0x130   :  { %v1374_v28 = vmul.f32 -1.442695, %v273_v27 }
 0x132   :  { %1675 = vpow2.f32 %v1374_v28 }
 0x13c   :  { %v1676_v29 = vpop.eup %1675 }
 0x13d   :  { %v277_v30 = vadd.f32 1.0, %v1676_v29 }
 0x13f   :  { %1677 = vrcp.f32 %v277_v30 }
 0x149   :  { %v1678_v31 = vpop.eup %1677 }
 0x19f   :  { %v286_v32 = vpop.permute.xlu0 %285 }
 0x1a0   :  { %v288_v33 = vmul.f32 %v1678_v31, %v286_v32 }
 0x1a2   :  { %290 = vrot.lane.b32.xlu1 %v288_v33, %s1830_s1 }
 0x214   :  { %v291_v34 = vpop.permute.xlu1 %290 }
 0x215   :  { %v293_v35 = vadd.f32 %v291_v34, %v2022_v26 }
 0x217   :  { %1679 = vtanh.f32 %v293_v35 }
 0x221   :  { %v1680_v36 = vpop.eup %1679 }
 0x222   :  { %v295_v37 = vsub.f32 0.0, %v1680_v36 }
 0x224   :  { %297 = vrot.lane.b32.xlu1 %v295_v37, %s1831_s3 }
 0x296   :  { %v298_v38 = vpop.permute.xlu1 %297 }
 0x297   :  { %v300_v39 = vmul.f32 %v1678_v31, %v298_v38 }
 0x299   :  { %302 = vrot.lane.b32.xlu0 %v300_v39, %s1832_s0 }
 0x30b   :  { %v303_v40 = vpop.permute.xlu0 %302 }
 0x30c   :  { %v305_v41 = vadd.f32 %v1680_v36, %v303_v40 }
 0x30e   :  { %307 = vrot.lane.b32.xlu1 %v305_v41, %s1830_s1 }
 0x380   :  { %v308_v42 = vpop.permute.xlu1 %307 }
 0x381   :  { %1488 = vmatmul.mubr.msk.f32.vlgmr.msra.gmra.mrb[2].mxu0 %vm112_vm1, %v308_v42 }
 0x382   :  { %1617 = vmatpush3.bf16.msra.mxu0 %v1985_v10  ;;  %1509 = vmatprep.mubr.msk.f32.mxu0 %vm1828_vm0, %v1829_v2 }
 0x383   :  { %1618 = vmatprep.subr.bf16.mxu0 %v1827_v1 }
 0x386   :  { %1620 = vmatpush3.bf16.msra.mxu0 %v1992_v16 }
 0x387   :  { %1627 = vmatprep.subr.bf16.mxu0 %v1827_v1 }
 0x454   :  { %v377_v43 = vpop.f32.mrb[2].mxu0 }
 0x455   :  { %v391_v44 = vadd.f32 %v377_v43, %v2013_v18  ;;  %v1489_v45 = vpop.f32.mrb[3].mxu0  ;;  %v382_v47 = vrot.slane %v377_v43, 6 }
 0x457   :  { %v393_v46 = vrot.slane %v391_v44, 6  ;;  %v384_v48 = vadd.f32 %v382_v47, %v2022_v26 }
 0x459   :  { %394 = vrot.lane.b32.xlu0 %v393_v46, %s1830_s1  ;;  %v1376_v49 = vmul.f32 -1.442695, %v384_v48 }
 0x45b   :  { %1681 = vpow2.f32 %v1376_v49 }
 0x465   :  { %v1682_v50 = vpop.eup %1681 }
 0x466   :  { %v388_v51 = vadd.f32 1.0, %v1682_v50 }
 0x468   :  { %1683 = vrcp.f32 %v388_v51 }
 0x472   :  { %v1684_v52 = vpop.eup %1683 }
 0x4cb   :  { %v395_v53 = vpop.permute.xlu0 %394 }
 0x4cc   :  { %v397_v54 = vmul.f32 %v1684_v52, %v395_v53 }
 0x4ce   :  { %399 = vrot.lane.b32.xlu1 %v397_v54, %s1830_s1 }
 0x540   :  { %v400_v55 = vpop.permute.xlu1 %399 }
 0x541   :  { %v402_v56 = vadd.f32 %v400_v55, %v2022_v26 }
 0x543   :  { %1685 = vtanh.f32 %v402_v56 }
 0x54d   :  { %v1686_v57 = vpop.eup %1685 }
 0x54e   :  { %v405_v58 = vrot.slane %v1686_v57, 2 }
 0x550   :  { %v407_v59 = vsub.f32 %v305_v41, %v405_v58 }
 0x552   :  { %v409_v60 = vrot.slane %v407_v59, 6 }
 0x554   :  { %410 = vrot.lane.b32.xlu0 %v409_v60, %s1831_s3 }
 0x5c6   :  { %v411_v61 = vpop.permute.xlu0 %410 }
 0x5c7   :  { %v413_v62 = vmul.f32 %v1684_v52, %v411_v61 }
 0x5c9   :  { %415 = vrot.lane.b32.xlu1 %v413_v62, %s1832_s0 }
 0x63b   :  { %v416_v63 = vpop.permute.xlu1 %415 }
 0x63c   :  { %v418_v0 = vadd.f32 %v1686_v57, %v416_v63 }
 0x63e   :  { %v420_v3 = vrot.slane %v418_v0, 2 }
 0x640   :  { %421 = vrot.lane.b32.xlu0 %v420_v3, %s1830_s1 }
 0x6b2   :  { %v422_v4 = vpop.permute.xlu0 %421 }
 0x6b3   :  { %1499 = vmatmul.mubr.msk.f32.vlgmr.msra.gmra.mrb[2].mxu1 %vm112_vm1, %v422_v4 }
 0x6b4   :  { %1623 = vmatpush3.bf16.msra.mxu1 %v1985_v10  ;;  %1520 = vmatprep.mubr.msk.f32.mxu1 %vm1828_vm0, %v1829_v2 }
 0x6b5   :  { %1624 = vmatprep.subr.bf16.mxu1 %v1827_v1 }
 0x6b8   :  { %1626 = vmatpush3.bf16.msra.mxu1 %v1992_v16 }
 0x6b9   :  { %1633 = vmatprep.subr.bf16.mxu1 %v1827_v1 }
 0x786   :  { %v491_v5 = vpop.f32.mrb[2].mxu1 }
 0x787   :  { %v505_v6 = vadd.f32 %v491_v5, %v2013_v18  ;;  %v1500_v7 = vpop.f32.mrb[3].mxu1  ;;  %v496_v9 = vrot.slane %v491_v5, 4 }
 0x789   :  { %v507_v8 = vrot.slane %v505_v6, 4  ;;  %v498_v11 = vadd.f32 %v496_v9, %v2022_v26 }
 0x78b   :  { %508 = vrot.lane.b32.xlu1 %v507_v8, %s1830_s1  ;;  %v1378_v12 = vmul.f32 -1.442695, %v498_v11 }
 0x78d   :  { %1687 = vpow2.f32 %v1378_v12 }
 0x797   :  { %v1688_v13 = vpop.eup %1687 }
 0x798   :  { %v502_v14 = vadd.f32 1.0, %v1688_v13 }
 0x79a   :  { %1689 = vrcp.f32 %v502_v14 }
 0x7a4   :  { %v1690_v15 = vpop.eup %1689 }
 0x7fd   :  { %v509_v17 = vpop.permute.xlu1 %508 }
 0x7fe   :  { %v511_v19 = vmul.f32 %v1690_v15, %v509_v17 }
 0x800   :  { %513 = vrot.lane.b32.xlu0 %v511_v19, %s1830_s1 }
 0x872   :  { %v514_v20 = vpop.permute.xlu0 %513 }
 0x873   :  { %v516_v21 = vadd.f32 %v514_v20, %v2022_v26 }
 0x875   :  { %1691 = vtanh.f32 %v516_v21 }
 0x87f   :  { %v1692_v22 = vpop.eup %1691 }
 0x880   :  { %v519_v24 = vrot.slane %v1692_v22, 2 }
 0x882   :  { %v521_v25 = vsub.f32 %v418_v0, %v519_v24 }
 0x884   :  { %v523_v27 = vrot.slane %v521_v25, 6 }
 0x886   :  { %524 = vrot.lane.b32.xlu1 %v523_v27, %s1831_s3 }
 0x8f8   :  { %v525_v28 = vpop.permute.xlu1 %524 }
 0x8f9   :  { %v527_v29 = vmul.f32 %v1690_v15, %v525_v28 }
 0x8fb   :  { %529 = vrot.lane.b32.xlu0 %v527_v29, %s1832_s0 }
 0x96d   :  { %v530_v30 = vpop.permute.xlu0 %529 }
 0x96e   :  { %v532_v31 = vadd.f32 %v1692_v22, %v530_v30 }
 0x970   :  { %v534_v32 = vrot.slane %v532_v31, 4 }
 0x972   :  { %535 = vrot.lane.b32.xlu1 %v534_v32, %s1830_s1 }
 0x9e4   :  { %v536_v33 = vpop.permute.xlu1 %535 }
 0x9e5   :  { %1510 = vmatmul.mubr.msk.f32.vlgmr.msra.gmra.mrb[4].mxu0 %vm112_vm1, %v536_v33 }
 0x9e6   :  { %1629 = vmatpush3.bf16.msra.mxu0 %v1985_v10  ;;  %1531 = vmatprep.mubr.msk.f32.mxu0 %vm1828_vm0, %v1829_v2 }
 0x9e7   :  { %1630 = vmatprep.subr.bf16.mxu0 %v1827_v1 }
 0x9ea   :  { %1632 = vmatpush3.bf16.msra.mxu0 %v1992_v16 }
 0x9eb   :  { %1639 = vmatprep.subr.bf16.mxu0 %v1827_v1 }
 0xab8   :  { %v605_v34 = vpop.f32.mrb[4].mxu0 }
 0xab9   :  { %v619_v35 = vadd.f32 %v605_v34, %v2013_v18  ;;  %v1511_v36 = vpop.f32.mrb[5].mxu0  ;;  %v610_v38 = vrot.slane %v605_v34, 2 }
 0xabb   :  { %v621_v37 = vrot.slane %v619_v35, 2  ;;  %v612_v39 = vadd.f32 %v610_v38, %v2022_v26 }
 0xabd   :  { %622 = vrot.lane.b32.xlu0 %v621_v37, %s1830_s1  ;;  %v1380_v40 = vmul.f32 -1.442695, %v612_v39 }
 0xabf   :  { %1693 = vpow2.f32 %v1380_v40 }
 0xac9   :  { %v1694_v41 = vpop.eup %1693 }
 0xaca   :  { %v616_v42 = vadd.f32 1.0, %v1694_v41 }
 0xacc   :  { %1695 = vrcp.f32 %v616_v42 }
 0xad6   :  { %v1696_v43 = vpop.eup %1695 }
 0xb2f   :  { %v623_v44 = vpop.permute.xlu0 %622 }
 0xb30   :  { %v625_v45 = vmul.f32 %v1696_v43, %v623_v44 }
 0xb32   :  { %627 = vrot.lane.b32.xlu1 %v625_v45, %s1830_s1 }
 0xba4   :  { %v628_v46 = vpop.permute.xlu1 %627 }
 0xba5   :  { %v630_v47 = vadd.f32 %v628_v46, %v2022_v26 }
 0xba7   :  { %1697 = vtanh.f32 %v630_v47 }
 0xbb1   :  { %v1698_v48 = vpop.eup %1697 }
 0xbb2   :  { %v633_v49 = vrot.slane %v1698_v48, 2 }
 0xbb4   :  { %v635_v50 = vsub.f32 %v532_v31, %v633_v49 }
 0xbb6   :  { %v637_v51 = vrot.slane %v635_v50, 6 }
 0xbb8   :  { %638 = vrot.lane.b32.xlu0 %v637_v51, %s1831_s3 }
 0xc2a   :  { %v639_v52 = vpop.permute.xlu0 %638 }
 0xc2b   :  { %v641_v53 = vmul.f32 %v1696_v43, %v639_v52 }
 0xc2d   :  { %643 = vrot.lane.b32.xlu1 %v641_v53, %s1832_s0 }
 0xc9f   :  { %v644_v54 = vpop.permute.xlu1 %643 }
 0xca0   :  { %v646_v55 = vadd.f32 %v1698_v48, %v644_v54 }
 0xca2   :  { %v648_v56 = vrot.slane %v646_v55, 6 }
 0xca4   :  { %649 = vrot.lane.b32.xlu0 %v648_v56, %s1830_s1 }
 0xd16   :  { %v650_v57 = vpop.permute.xlu0 %649 }
 0xd17   :  { %1521 = vmatmul.mubr.msk.f32.vlgmr.msra.gmra.mrb[4].mxu1 %vm112_vm1, %v650_v57 }
 0xd18   :  { %1635 = vmatpush3.bf16.msra.mxu1 %v1985_v10  ;;  %1542 = vmatprep.mubr.msk.f32.mxu1 %vm1828_vm0, %v1829_v2 }
 0xd19   :  { %1636 = vmatprep.subr.bf16.mxu1 %v1827_v1 }
 0xd1c   :  { %1638 = vmatpush3.bf16.msra.mxu1 %v1992_v16 }
 0xd1d   :  { %1645 = vmatprep.subr.bf16.mxu1 %v1827_v1 }
 0xdea   :  { %v719_v26 = vpop.f32.mrb[4].mxu1 }
 0xdeb   :  { %v730_v58 = vadd.f32 %v719_v26, %v2013_v18  ;;  %v1522_v59 = vpop.f32.mrb[5].mxu1  ;;  %v723_v60 = vadd.f32 %v719_v26, %v2019_v23 }
 0xded   :  { %732 = vrot.lane.b32.xlu1 %v730_v58, %s1830_s1  ;;  %v1382_v61 = vmul.f32 -1.442695, %v723_v60 }
 0xdef   :  { %1699 = vpow2.f32 %v1382_v61 }
 0xdf9   :  { %v1700_v62 = vpop.eup %1699 }
 0xdfa   :  { %v727_v63 = vadd.f32 1.0, %v1700_v62 }
 0xdfc   :  { %1701 = vrcp.f32 %v727_v63 }
 0xe06   :  { %v1702_v0 = vpop.eup %1701 }
 0xe5f   :  { %v733_v3 = vpop.permute.xlu1 %732 }
 0xe60   :  { %v735_v4 = vmul.f32 %v1702_v0, %v733_v3 }
 0xe62   :  { %737 = vrot.lane.b32.xlu0 %v735_v4, %s1830_s1 }
 0xed4   :  { %v738_v5 = vpop.permute.xlu0 %737 }
 0xed5   :  { %v740_v6 = vadd.f32 %v738_v5, %v2019_v23 }
 0xed7   :  { %1703 = vtanh.f32 %v740_v6 }
 0xee1   :  { %v1704_v7 = vpop.eup %1703 }
 0xee2   :  { %v743_v8 = vrot.slane %v1704_v7, 2 }
 0xee4   :  { %v745_v9 = vsub.f32 %v646_v55, %v743_v8 }
 0xee6   :  { %v747_v11 = vrot.slane %v745_v9, 6 }
 0xee8   :  { %748 = vrot.lane.b32.xlu1 %v747_v11, %s1831_s3 }
 0xf5a   :  { %v749_v12 = vpop.permute.xlu1 %748 }
 0xf5b   :  { %v751_v13 = vmul.f32 %v1702_v0, %v749_v12 }
 0xf5d   :  { %753 = vrot.lane.b32.xlu0 %v751_v13, %s1832_s0 }
 0xfcf   :  { %v754_v14 = vpop.permute.xlu0 %753 }
 0xfd0   :  { %v756_v15 = vadd.f32 %v1704_v7, %v754_v14 }
 0xfd2   :  { %758 = vrot.lane.b32.xlu1 %v756_v15, %s1830_s1 }
0x1044   :  { %v759_v17 = vpop.permute.xlu1 %758 }
0x1045   :  { %1532 = vmatmul.mubr.msk.f32.vlgmr.msra.gmra.mrb[6].mxu0 %vm112_vm1, %v759_v17 }
0x1046   :  { %1641 = vmatpush3.bf16.msra.mxu0 %v1985_v10  ;;  %1553 = vmatprep.mubr.msk.f32.mxu0 %vm1828_vm0, %v1829_v2 }
0x1047   :  { %1642 = vmatprep.subr.bf16.mxu0 %v1827_v1 }
0x104a   :  { %1644 = vmatpush3.bf16.msra.mxu0 %v1992_v16 }
0x104b   :  { %1651 = vmatprep.subr.bf16.mxu0 %v1827_v1 }
0x1118   :  { %v828_v19 = vpop.f32.mrb[6].mxu0 }
0x1119   :  { %v842_v20 = vadd.f32 %v828_v19, %v2013_v18  ;;  %v1533_v21 = vpop.f32.mrb[7].mxu0  ;;  %v833_v24 = vrot.slane %v828_v19, 6 }
0x111b   :  { %v844_v22 = vrot.slane %v842_v20, 6  ;;  %v835_v25 = vadd.f32 %v833_v24, %v2019_v23 }
0x111d   :  { %845 = vrot.lane.b32.xlu0 %v844_v22, %s1830_s1  ;;  %v1384_v10 = vmul.f32 -1.442695, %v835_v25  ;;  %v1098_v25 = vld [vmem:[#allocation7] sm:$0xff] }
0x111f   :  { %1705 = vpow2.f32 %v1384_v10  ;;  %v1099_v10 = vld [vmem:[#allocation7 + $0x8] sm:$0xff] }
0x1129   :  { %v1706_v27 = vpop.eup %1705 }
0x112a   :  { %v839_v28 = vadd.f32 1.0, %v1706_v27  ;;  %v1100_v27 = vld [vmem:[#allocation7 + $0x10] sm:$0xff] }
0x112c   :  { %1707 = vrcp.f32 %v839_v28  ;;  %v1646_v28 = vpack.c.bf16 %v1099_v10, %v1098_v25 }
0x1136   :  { %v1708_v29 = vpop.eup %1707 }
0x118f   :  { %v846_v30 = vpop.permute.xlu0 %845 }
0x1190   :  { %v848_v16 = vmul.f32 %v1708_v29, %v846_v30 }
0x1192   :  { %850 = vrot.lane.b32.xlu1 %v848_v16, %s1830_s1 }
0x1204   :  { %v851_v31 = vpop.permute.xlu1 %850 }
0x1205   :  { %v853_v32 = vadd.f32 %v851_v31, %v2019_v23 }
0x1207   :  { %1709 = vtanh.f32 %v853_v32  ;;  %v1187_v32 = vld [vmem:[#allocation8 + $0x8] sm:$0xff] }
0x1211   :  { %v1710_v33 = vpop.eup %1709 }
0x1212   :  { %v856_v34 = vrot.slane %v1710_v33, 2 }
0x1214   :  { %v858_v35 = vsub.f32 %v756_v15, %v856_v34 }
0x1216   :  { %v860_v36 = vrot.slane %v858_v35, 6 }
0x1218   :  { %861 = vrot.lane.b32.xlu0 %v860_v36, %s1831_s3 }
0x128a   :  { %v862_v37 = vpop.permute.xlu0 %861 }
0x128b   :  { %v864_v38 = vmul.f32 %v1708_v29, %v862_v37  ;;  %v1101_v29 = vld [vmem:[#allocation7 + $0x18] sm:$0xff] }
0x128c   :  { %v1649_v30 = vpack.c.bf16 %v1101_v29, %v1100_v27 }
0x128d   :  { %866 = vrot.lane.b32.xlu1 %v864_v38, %s1832_s0  ;;  %v1188_v38 = vld [vmem:[#allocation8 + $0x10] sm:$0xff] }
0x12ff   :  { %v867_v39 = vpop.permute.xlu1 %866 }
0x1300   :  { %v869_v40 = vadd.f32 %v1710_v33, %v867_v39  ;;  %v1189_v39 = vld [vmem:[#allocation8 + $0x18] sm:$0xff] }
0x1302   :  { %v871_v41 = vrot.slane %v869_v40, 2 }
0x1304   :  { %872 = vrot.lane.b32.xlu0 %v871_v41, %s1830_s1  ;;  %v1271_v41 = vld [vmem:[%s2166_s9] sm:$0xff] }
0x1376   :  { %v873_v42 = vpop.permute.xlu0 %872 }
0x1377   :  { %1543 = vmatmul.mubr.msk.f32.vlgmr.msra.gmra.mrb[6].mxu1 %vm112_vm1, %v873_v42  ;;  %v1272_v42 = vld [vmem:[%s2166_s9 + $0x8] sm:$0xff] }
0x1378   :  { %1564 = vmatprep.mubr.msk.f32.mxu1 %vm1828_vm0, %v1829_v2  ;;  %1647 = vmatpush3.bf16.msra.mxu1 %v1646_v28 }
0x1379   :  { %1648 = vmatprep.subr.bf16.mxu1 %v1827_v1 }
0x137c   :  { %1650 = vmatpush3.bf16.msra.mxu1 %v1649_v30 }
0x137d   :  { %1657 = vmatprep.subr.bf16.mxu1 %v1827_v1 }
0x144a   :  { %v942_v43 = vpop.f32.mrb[6].mxu1 }
0x144b   :  { %v956_v44 = vadd.f32 %v942_v43, %v2013_v18  ;;  %v1544_v45 = vpop.f32.mrb[7].mxu1  ;;  %v947_v47 = vrot.slane %v942_v43, 4  ;;  %v1658_v43 = vpack.c.bf16 %v1272_v42, %v1271_v41 }
0x144d   :  { %v958_v46 = vrot.slane %v956_v44, 4  ;;  %v949_v48 = vadd.f32 %v947_v47, %v2019_v23 }
0x144f   :  { %959 = vrot.lane.b32.xlu1 %v958_v46, %s1830_s1  ;;  %v1386_v49 = vmul.f32 -1.442695, %v949_v48  ;;  %v1273_v48 = vld [vmem:[%s2166_s9 + $0x10] sm:$0xff] }
0x1451   :  { %1711 = vpow2.f32 %v1386_v49  ;;  %v1274_v49 = vld [vmem:[%s2166_s9 + $0x18] sm:$0xff] }
0x145b   :  { %v1712_v50 = vpop.eup %1711 }
0x145c   :  { %v953_v51 = vadd.f32 1.0, %v1712_v50  ;;  %v1661_v50 = vpack.c.bf16 %v1274_v49, %v1273_v48 }
0x145e   :  { %1713 = vrcp.f32 %v953_v51 }
0x1468   :  { %v1714_v52 = vpop.eup %1713 }
0x14c1   :  { %v960_v53 = vpop.permute.xlu1 %959 }
0x14c2   :  { %v962_v54 = vmul.f32 %v1714_v52, %v960_v53 }
0x14c4   :  { %964 = vrot.lane.b32.xlu0 %v962_v54, %s1830_s1 }
0x1536   :  { %v965_v55 = vpop.permute.xlu0 %964 }
0x1537   :  { %v967_v56 = vadd.f32 %v965_v55, %v2019_v23  ;;  %v1393_v55 = vld [vmem:[#allocation2] ss:$0 sm:$0xff] }
0x1539   :  { %1715 = vtanh.f32 %v967_v56 }
0x1543   :  { %v1716_v57 = vpop.eup %1715 }
0x1544   :  { %v970_v26 = vrot.slane %v1716_v57, 2 }
0x1546   :  { %v972_v58 = vsub.f32 %v869_v40, %v970_v26  ;;  %v1655_v40 = vpack.c.bf16 %v1189_v39, %v1188_v38 }
0x1548   :  { %v974_v59 = vrot.slane %v972_v58, 6 }
0x154a   :  { %975 = vrot.lane.b32.xlu1 %v974_v59, %s1831_s3 }
0x15bc   :  { %v976_v60 = vpop.permute.xlu1 %975 }
0x15bd   :  { %v978_v61 = vmul.f32 %v1714_v52, %v976_v60 }
0x15bf   :  { %980 = vrot.lane.b32.xlu0 %v978_v61, %s1832_s0 }
0x1631   :  { %v981_v62 = vpop.permute.xlu0 %980 }
0x1632   :  { %v983_v63 = vadd.f32 %v1716_v57, %v981_v62 }
0x1634   :  { %v985_v0 = vrot.slane %v983_v63, 4 }
0x1636   :  { %986 = vrot.lane.b32.xlu1 %v985_v0, %s1830_s1 }
0x16a8   :  { %v987_v3 = vpop.permute.xlu1 %986 }
0x16a9   :  { %1554 = vmatmul.mubr.msk.f32.vlgmr.msra.gmra.mrb[8].mxu0 %vm112_vm1, %v987_v3 }
0x16aa   :  { %1575 = vmatprep.mubr.msk.f32.mxu0 %vm1828_vm0, %v1829_v2 }
0x177c   :  { %v1056_v4 = vpop.f32.mrb[8].mxu0 }
0x177d   :  { %v1070_v5 = vadd.f32 %v1056_v4, %v2013_v18  ;;  %v1555_v6 = vpop.f32.mrb[9].mxu0  ;;  %v1061_v8 = vrot.slane %v1056_v4, 2 }
0x177f   :  { %v1072_v7 = vrot.slane %v1070_v5, 2  ;;  %v1063_v9 = vadd.f32 %v1061_v8, %v2019_v23 }
0x1781   :  { %1073 = vrot.lane.b32.xlu0 %v1072_v7, %s1830_s1  ;;  %v1388_v11 = vmul.f32 -1.442695, %v1063_v9 }
0x1783   :  { %1717 = vpow2.f32 %v1388_v11 }
0x178d   :  { %v1718_v12 = vpop.eup %1717 }
0x178e   :  { %v1067_v13 = vadd.f32 1.0, %v1718_v12 }
0x1790   :  { %1719 = vrcp.f32 %v1067_v13 }
0x179a   :  { %v1720_v14 = vpop.eup %1719 }
0x17f3   :  { %v1074_v15 = vpop.permute.xlu0 %1073 }
0x17f4   :  { %v1076_v17 = vmul.f32 %v1720_v14, %v1074_v15 }
0x17f6   :  { %1078 = vrot.lane.b32.xlu1 %v1076_v17, %s1830_s1 }
0x1868   :  { %v1079_v19 = vpop.permute.xlu1 %1078 }
0x1869   :  { %v1081_v18 = vadd.f32 %v1079_v19, %v2019_v23  ;;  %v1186_v23 = vld [vmem:[#allocation8] sm:$0xff] }
0x186a   :  { %v1652_v33 = vpack.c.bf16 %v1187_v32, %v1186_v23 }
0x186b   :  { %1721 = vtanh.f32 %v1081_v18 }
0x186c   :  { %1653 = vmatpush3.bf16.msra.mxu0 %v1652_v33 }
0x186d   :  { %1654 = vmatprep.subr.bf16.mxu0 %v1827_v1 }
0x1870   :  { %1656 = vmatpush3.bf16.msra.mxu0 %v1655_v40 }
0x1875   :  { %v1722_v20 = vpop.eup %1721 }
0x1876   :  { %v1084_v21 = vrot.slane %v1722_v20, 2 }
0x1878   :  { %v1086_v22 = vsub.f32 %v983_v63, %v1084_v21 }
0x187a   :  { %v1088_v24 = vrot.slane %v1086_v22, 6 }
0x187c   :  { %1089 = vrot.lane.b32.xlu0 %v1088_v24, %s1831_s3 }
0x18ee   :  { %v1090_v16 = vpop.permute.xlu0 %1089 }
0x18ef   :  { %v1092_v31 = vmul.f32 %v1720_v14, %v1090_v16 }
0x18f1   :  { %1094 = vrot.lane.b32.xlu1 %v1092_v31, %s1832_s0 }
0x1963   :  { %v1095_v34 = vpop.permute.xlu1 %1094 }
0x1964   :  { %v1097_v35 = vadd.f32 %v1722_v20, %v1095_v34 }
0x1966   :  { %v1110_v36 = vrot.slane %v1097_v35, 6 }
0x1968   :  { %1111 = vrot.lane.b32.xlu0 %v1110_v36, %s1830_s1 }
0x19da   :  { %v1112_v37 = vpop.permute.xlu0 %1111 }
0x19db   :  { %1565 = vmatmul.mubr.msk.f32.vlgmr.msra.gmra.mrb[8].mxu1 %vm112_vm1, %v1112_v37 }
0x19dc   :  { %1586 = vmatprep.mubr.msk.f32.mxu1 %vm1828_vm0, %v1829_v2  ;;  %1659 = vmatpush3.bf16.msra.mxu1 %v1658_v43  ;;  %v1389_v2 = vld [vmem:[%s2163_s6] ss:$0 sm:$0xff] }
0x19dd   :  { %1660 = vmatprep.subr.bf16.mxu1 %v1827_v1  ;;  %v1391_v1 = vld [vmem:[%s2165_s8] ss:$0 sm:$0xff] }
0x19e0   :  { %1662 = vmatpush3.bf16.msra.mxu1 %v1661_v50 }
0x1aae   :  { %v1181_v44 = vpop.f32.mrb[8].mxu1 }
0x1aaf   :  { %v1182_v45 = vadd.f32 %v1389_v2, %v1181_v44  ;;  %v1566_v46 = vpop.f32.mrb[9].mxu1 }
0x1ab1   :  { %v1185_v47 = vmax.f32 %v1182_v45, 0.0 }
0x1ab3   :  { %1576 = vmatmul.mubr.msk.f32.vlgmr.msra.gmra.mrb[10].mxu0 %vm112_vm1, %v1185_v47 }
0x1b86   :  { %v1266_v51 = vpop.f32.mrb[10].mxu0 }
0x1b87   :  { %v1267_v52 = vadd.f32 %v1391_v1, %v1266_v51  ;;  %v1577_v53 = vpop.f32.mrb[11].mxu0 }
0x1b89   :  { %v1270_v54 = vmax.f32 %v1267_v52, 0.0 }
0x1b8b   :  { %1587 = vmatmul.mubr.msk.f32.vlgmr.msra.gmra.mrb[10].mxu1 %vm112_vm1, %v1270_v54 }
0x1c5e   :  { %v1351_v56 = vpop.f32.mrb[10].mxu1 }
0x1c5f   :  { %v1352_v57 = vadd.f32 %v1393_v55, %v1351_v56  ;;  %v1588_v26 = vpop.f32.mrb[11].mxu1 }
0x1c61   :  { %v1395_v58 = vmul.f32 -1.442695, %v1352_v57 }
0x1c63   :  { %1723 = vpow2.f32 %v1395_v58 }
0x1c6d   :  { %v1724_v59 = vpop.eup %1723 }
0x1c6e   :  { %v1358_v60 = vadd.f32 1.0, %v1724_v59 }
0x1c70   :  { %1725 = vrcp.f32 %v1358_v60 }
0x1c7a   :  { %v1726_v61 = vpop.eup %1725 }
0x1c7b   :  { %1362 = vst.msk [vmem:[%s2168_s11] sm:$0x3] %vm1361_vm2, %v1726_v61 }
0x1c7c   :  { %1367 = vsyncpa [#allocation4], 1 }
0x1c7d   :  { %1368 = vsyncpa [#allocation6], 1 }
0x1c7e   :  { %1369 = vsyncpa [#allocation9], 1 }

</bundles_post_ra>
